<compile_context>
chip_gen: v7x
topology: tpu7x:2x2x1
jax: 0.10.0
libtpu: 0.0.40
codegen_flags: <defaults>
</compile_context>

<pallas_src>
import jax
import jax.numpy as jnp
from jax.experimental import pallas as pl
from jax.experimental.pallas import tpu as pltpu


def glinear_kernel(g_ref, out_ref):
    # g_ref: (1, dim) resident parameter tile; out_ref: (tb, dim) batch tile.
    # Body is a single sublane broadcast + store (kernel is pure HBM-write-bound).
    out_ref[...] = jnp.broadcast_to(g_ref[...], out_ref.shape).astype(out_ref.dtype)


def _compute_batch_tile(B, dim, dtype):
    """Pick the batch tile by VMEM bytes, not a fixed row count."""
    itemsize = jnp.dtype(dtype).itemsize
    # Sublane packing: 8 rows for 32-bit, 16 for 16-bit, 32 for 8-bit dtypes.
    pack = max(8, 32 // itemsize)
    # ~4 MiB per output tile; double-buffered -> ~8 MiB, fits v5e's 16 MiB
    # default scoped VMEM and leaves large headroom on v6e/v7x.
    budget_bytes = 4 * 1024 * 1024
    tb = (budget_bytes // (dim * itemsize)) // pack * pack
    tb = max(tb, pack)
    # Prefer >= 2 grid steps so the "parallel" batch axis shards across both
    # TensorCores on v7x (doubles effective writeback bandwidth).
    if B >= 2 * pack:
        half = (B + 1) // 2
        half = (half + pack - 1) // pack * pack
        tb = min(tb, half)
    if tb >= B:
        # Block == full array extent is always legal (no divisibility constraint).
        tb = B
    return tb


def glinear_forward(x, G):
    """x: (B, ...) — only x.shape[0] is used.  G: (1, dim).  Returns (B, dim)."""
    B = x.shape[0]
    dim = G.shape[1]
    itemsize = jnp.dtype(G.dtype).itemsize

    tb = _compute_batch_tile(B, dim, G.dtype)
    grid = (pl.cdiv(B, tb),)  # partial last block is masked by Pallas

    return pl.pallas_call(
        glinear_kernel,
        out_shape=jax.ShapeDtypeStruct((B, dim), G.dtype),
        grid_spec=pltpu.PrefetchScalarGridSpec(
            num_scalar_prefetch=0,
            grid=grid,
            # G_ stays resident in VMEM across all grid steps.
            in_specs=[pl.BlockSpec((1, dim), lambda i: (0, 0))],
            # dim whole on the lane axis -> contiguous, unmasked output stores.
            out_specs=pl.BlockSpec((tb, dim), lambda i: (i, 0)),
        ),
        compiler_params=pltpu.CompilerParams(
            dimension_semantics=("parallel",),
        ),
        cost_estimate=pl.CostEstimate(
            flops=0,
            transcendentals=0,
            bytes_accessed=(B * dim + dim) * itemsize,
        ),
    )(G)


def glinear_reference(x, G):
    return jnp.broadcast_to(G, (x.shape[0], G.shape[1]))


if __name__ == "__main__":
    B, dim = 8, 128  # small, lane-dense example

    key = jax.random.PRNGKey(0)
    kx, kg = jax.random.split(key, 2)

    x = jax.random.normal(kx, (B, dim), dtype=jnp.float32)
    G = jax.random.normal(kg, (1, dim), dtype=jnp.float32)  # GLinear.G_

    out = glinear_forward(x, G)
    out = jax.block_until_ready(out)

    ref = glinear_reference(x, G)
    assert out.shape == (B, dim)
    assert jnp.allclose(out, ref, atol=0.0, rtol=0.0)

    print("KERNEL_OK")
</pallas_src>

<mosaic_0001>
module attributes {stable_mosaic.version = 11 : i64} {
  func.func @glinear_kernel(%arg0: i32, %arg1: memref<1x128xf32, #tpu.memory_space<vmem>>, %arg2: memref<8x128xf32, #tpu.memory_space<vmem>>) attributes {dimension_semantics = [#tpu.dimension_semantics<parallel>], iteration_bounds = array<i64: 1>, scalar_prefetch = 0 : i64, scratch_operands = 0 : i64, tpu.core_type = #tpu.core_type<tc>, window_params = [{pipeline_mode = #tpu.pipeline_mode<synchronous>, transform_indices = @transform_0, window_bounds = array<i64: 1, 128>}, {transform_indices = @transform_1, window_bounds = array<i64: 8, 128>}]} {
    %c0 = arith.constant 0 : index
    %c0_0 = arith.constant 0 : index
    %0 = vector.load %arg1[%c0, %c0_0] : memref<1x128xf32, #tpu.memory_space<vmem>>, vector<1x128xf32>
    %1 = vector.shape_cast %0 : vector<1x128xf32> to vector<1x128xf32>
    %2 = vector.broadcast %1 : vector<1x128xf32> to vector<8x128xf32>
    %c0_1 = arith.constant 0 : index
    %c0_2 = arith.constant 0 : index
    %3 = vector.load %arg2[%c0_1, %c0_2] : memref<8x128xf32, #tpu.memory_space<vmem>>, vector<8x128xf32>
    tpu.vector_store %arg2[%c0_1, %c0_2], %2 {strides = array<i32>} : memref<8x128xf32, #tpu.memory_space<vmem>>, vector<8x128xf32>,
    return
  }
  func.func @transform_0(%arg0: i32) -> (i32, i32) {
    %c0_i32 = arith.constant 0 : i32
    %c0_i32_0 = arith.constant 0 : i32
    %c0_i32_1 = arith.constant 0 : i32
    return %c0_i32, %c0_i32_0 : i32, i32
  }
  func.func @transform_1(%arg0: i32) -> (i32, i32) {
    %c0_i32 = arith.constant 0 : i32
    %c0_i32_0 = arith.constant 0 : i32
    return %arg0, %c0_i32 : i32, i32
  }
}

</mosaic_0001>

<bundles_post_ra>
// kernel: tpu_custom_call.1
= control target key start
LH: loop header
LB: loop body
LE: loop exit
PB: predicated region body
PF: predicated region fallthrough
CT: control target
= control target key end

     0   :  { %6 = vsyncpa [#allocation3], 0  ;;  %s131_s0 = inlined_call_operand.hbm [shape: f32[1,128], index: 0, kind: input, shape index: {}]   ;;  %s132_s1 = inlined_call_operand.hbm [shape: f32[8,128], index: 1, kind: output, shape index: {}]  }
   0x1   :  { %7 = vsyncpa [#allocation4], 0  ;;  %s95_s6 = smov [#allocation2]   ;;  %s47_s10 = scalar_lea.hbm %s131_s0, 16 }
   0x2   :  { %s14_s7 = sshll.u32 %s95_s6, 4  ;;  %p48_p0 = scmp.ne.s32.totalorder %s131_s0, %s47_s10  ;;  %s15_s7 = int_to_ptr.vmem [resolvable:$true] %s14_s7 }
   0x3   :  { %p51_p1 = scmp.lt.u32.totalorder %s47_s10, %s131_s0 }
   0x5   :  { %p53_p2 = pnand %p51_p1, %p48_p0 }
   0x7   :  { %56 = shalt.err (!%p53_p2)
}
   0x8   :  { %s57_s15 = scalar_lea.vmem %s15_s7, 16  ;;  %s61_s16 = scalar_lea.vmem %s15_s7, 32 }
   0x9   :  { %p58_p3 = scmp.ne.s32.totalorder %s15_s7, %s57_s15  ;;  %p62_p4 = scmp.lt.s32.totalorder %s15_s7, %s15_s7 }
   0xa   :  { %p63_p5 = scmp.lt.s32.totalorder %s61_s16, %s57_s15 }
   0xc   :  { %p64_p6 = por %p63_p5, %p62_p4 }
   0xe   :  { %p65_p7 = pnand %p64_p6, %p58_p3 }
  0x10   :  { %68 = shalt.err (!%p65_p7)
}
  0x11   :  { %17 = dma.hbm_to_vmem [thread:$0]  %s131_s0, 16, %s15_s7, [#allocation3]  }
  0x12   :  { %91 = dma.done.wait [#allocation3], 16  }
  0x13   :  { %92 = vsyncadd [#allocation3], 4294967280  ;;  %s96_s19 = smov [#allocation5]   ;;  %v44_v0 = vld [vmem:[#allocation2] ss:$0 sm:$0xff] }
  0x14   :  { %s35_s20 = sshll.u32 %s96_s19, 4  ;;  %28 = vst [vmem:[#allocation5] sm:$0xff] %v44_v0  ;;  %s36_s20 = int_to_ptr.vmem [resolvable:$true] %s35_s20 }
  0x15   :  { %s69_s21 = scalar_lea.vmem %s36_s20, 128  ;;  %p74_p9 = scmp.lt.s32.totalorder %s36_s20, %s36_s20 }
  0x16   :  { %p70_p8 = scmp.ne.s32.totalorder %s36_s20, %s69_s21  ;;  %p75_p10 = scmp.lt.s32.totalorder %s69_s21, %s69_s21 }
  0x18   :  { %p76_p11 = por %p75_p10, %p74_p9 }
  0x1a   :  { %p77_p12 = pnand %p76_p11, %p70_p8 }
  0x1c   :  { %80 = shalt.err (!%p77_p12)
}
  0x1d   :  { %s81_s24 = scalar_lea.hbm %s132_s1, 128 }
  0x1e   :  { %p82_p13 = scmp.ne.s32.totalorder %s132_s1, %s81_s24  ;;  %p85_p0 = scmp.lt.u32.totalorder %s81_s24, %s132_s1 }
  0x20   :  { %p87_p1 = pnand %p85_p0, %p82_p13 }
  0x22   :  { %90 = shalt.err (!%p87_p1)
}
  0x23   :  { %38 = dma.vmem_to_hbm [thread:$0]  %s36_s20, 128, %s132_s1, [#allocation4]  }
  0x24   :  { %93 = dma.done.wait [#allocation4], 128  }
  0x25   :  { %94 = vsyncadd [#allocation4], 4294967168 }
  0x26   :  { %42 = vsyncpa [#allocation3], 1 }
  0x27   :  { %43 = vsyncpa [#allocation4], 1 }

</bundles_post_ra>
